<compile_context>
chip_gen: v5e
topology: v5e:2x2
jax: 0.10.0
libtpu: 0.0.40
codegen_flags: <defaults>
</compile_context>

<pallas_src>
import jax
import jax.numpy as jnp
from jax.experimental import pallas as pl
from jax.experimental.pallas import tpu as pltpu

BN_EPS = 1e-5


# --------------------------------------------------------------------------- #
# Helpers
# --------------------------------------------------------------------------- #
def _round_up(x, m):
    return (x + m - 1) // m * m


def _cdiv(a, b):
    return (a + b - 1) // b


def _pad2(a, target_shape):
    """Zero-pad a 2-D array up to target_shape (no-op if already that shape)."""
    pr = target_shape[0] - a.shape[0]
    pc = target_shape[1] - a.shape[1]
    if pr == 0 and pc == 0:
        return a
    return jnp.pad(a, ((0, pr), (0, pc)))


def _vmem_cap_bytes():
    """Usable VMEM cap (leave headroom below physical for compiler scratch)."""
    try:
        phys = int(pltpu.get_tpu_info().vmem_capacity_bytes)
    except Exception:
        phys = 64 * 1024 * 1024            # conservative: v7x per-TC VMEM
    return int(phys * 0.75)                # 48 MiB on v7x, 96 MiB on v5e/v6e


# --------------------------------------------------------------------------- #
# Kernels
# --------------------------------------------------------------------------- #
def _fused_kernel(x_ref, w1_ref, b1_ref, w2_ref, b2_ref, o_ref):
    # Cast x in-kernel (no-op if already bf16): MXU eats bf16, accumulate f32.
    xb = x_ref[...].astype(jnp.bfloat16)
    h = jnp.dot(xb, w1_ref[...], preferred_element_type=jnp.float32)
    # BN already folded into w1/b1; bias + ReLU stay f32 (VPU friendly on v5e).
    h = jnp.maximum(h + b1_ref[...], 0.0)
    # Dropout: identity in eval mode.
    out = jnp.dot(h.astype(w2_ref.dtype), w2_ref[...],
                  preferred_element_type=jnp.float32) + b2_ref[...]
    o_ref[...] = out.astype(o_ref.dtype)


def _ktiled_kernel(x_ref, w1_ref, b1_ref, w2_ref, b2_ref, o_ref, acc_ref):
    # mid (hidden) dimension tiled; each mid-tile's hidden activation is exact
    # (full in_ch reduction), so ReLU per tile is exact; 2nd matmul accumulates.
    k = pl.program_id(1)

    @pl.when(k == 0)
    def _():
        acc_ref[...] = jnp.zeros_like(acc_ref)

    xb = x_ref[...].astype(jnp.bfloat16)
    h = jnp.dot(xb, w1_ref[...], preferred_element_type=jnp.float32)
    h = jnp.maximum(h + b1_ref[...], 0.0)
    acc_ref[...] += jnp.dot(h.astype(w2_ref.dtype), w2_ref[...],
                            preferred_element_type=jnp.float32)

    @pl.when(k == pl.num_programs(1) - 1)
    def _():
        o_ref[...] = (acc_ref[...] + b2_ref[...]).astype(o_ref.dtype)


# --------------------------------------------------------------------------- #
# One-time parameter preparation (hoisted out of the per-call hot path)
# --------------------------------------------------------------------------- #
def prepare_params(params, *, bn_eps=BN_EPS):
    """Fold eval-mode BatchNorm1d into Linear1, transpose, pad to 128, cast to
    bf16. Call once per parameter set and reuse the result across forwards."""
    w1 = jnp.asarray(params["w1"], jnp.float32)            # (mid, in_ch)
    b1 = jnp.asarray(params["b1"], jnp.float32)            # (mid,)
    gamma = jnp.asarray(params["gamma"], jnp.float32)
    beta = jnp.asarray(params["beta"], jnp.float32)
    rmean = jnp.asarray(params["running_mean"], jnp.float32)
    rvar = jnp.asarray(params["running_var"], jnp.float32)
    w2 = jnp.asarray(params["w2"], jnp.float32)            # (out_ch, mid)
    b2 = jnp.asarray(params["b2"], jnp.float32)            # (out_ch,)

    mid, in_ch = w1.shape
    out_ch = w2.shape[0]

    # BN fold (eval mode):  y = (x@w1^T + b1 - mean)*scale + beta
    scale = gamma * jax.lax.rsqrt(rvar + bn_eps)
    w1_fold = w1 * scale[:, None]
    b1_fold = (b1 - rmean) * scale + beta

    in_p = _round_up(in_ch, 128)
    mid_p = _round_up(mid, 128)
    out_p = _round_up(out_ch, 128)

    return {
        "in_ch": in_ch, "mid": mid, "out_ch": out_ch,
        "in_p": in_p, "mid_p": mid_p, "out_p": out_p,
        # Weights pre-transposed to (in, out); MXU operands bf16, biases f32.
        "w1_t": _pad2(w1_fold.T, (in_p, mid_p)).astype(jnp.bfloat16),
        "b1_row": _pad2(b1_fold.reshape(1, -1), (1, mid_p)),
        "w2_t": _pad2(w2.T, (mid_p, out_p)).astype(jnp.bfloat16),
        "b2_row": _pad2(b2.reshape(1, -1), (1, out_p)),
    }


# --------------------------------------------------------------------------- #
# Forward
# --------------------------------------------------------------------------- #
def channel_compress(x, prep, *, max_tile_m=512, force_mid_tiling=False,
                     mid_tile=None):
    """x: (N, in_ch). prep: output of prepare_params. Returns (N, out_ch) f32."""
    x = jnp.asarray(x)
    N, in_ch = x.shape
    assert in_ch == prep["in_ch"], "input feature dim mismatch"
    in_p, mid_p, out_p = prep["in_p"], prep["mid_p"], prep["out_p"]
    out_ch = prep["out_ch"]

    vmem_cap = _vmem_cap_bytes()

    # Resident footprint if all weights/biases stay in VMEM (single-buffered).
    weight_bytes = (in_p * mid_p + mid_p * out_p) * 2 + (mid_p + out_p) * 4
    use_ktiled = force_mid_tiling or weight_bytes > int(0.45 * vmem_cap)

    if not use_ktiled:
        # ----------------- fused path: weights fully resident ----------------
        # Size the batch tile from the VMEM left after the weight budget.
        per_row = (2 * in_p * 4            # x tile, double-buffered (worst case f32)
                   + 2 * out_p * 4         # out tile, double-buffered
                   + in_p * 2 + mid_p * 4 + out_p * 4)   # in-kernel temporaries
        free = max(vmem_cap - 2 * weight_bytes, 4 * 1024 * 1024)
        tm = min(max_tile_m, max(16, (free // per_row) // 16 * 16))

        # Balanced tiles; >=2 grid steps when N is big enough (v7x: 2 TCs).
        num_tiles = _cdiv(N, tm)
        if num_tiles == 1 and N >= 64:
            num_tiles = 2
        tm = _round_up(_cdiv(N, num_tiles), 16)
        n_p = num_tiles * tm

        needs_pad = (n_p != N) or (in_p != in_ch)
        if needs_pad:
            # Padding pass is needed anyway -> cast to bf16 in the same pass.
            x_in = _pad2(x.astype(jnp.float32), (n_p, in_p)).astype(jnp.bfloat16)
        else:
            # Aligned fast path: stream f32 straight from HBM, cast in-kernel.
            x_in = x.astype(jnp.float32)

        vmem_est = 2 * weight_bytes + tm * per_row
        compiler_params = pltpu.CompilerParams(
            dimension_semantics=("parallel",),
            vmem_limit_bytes=min(vmem_cap,
                                 max(int(1.25 * vmem_est), 32 * 1024 * 1024)),
        )
        flops = 2 * n_p * (in_p * mid_p + mid_p * out_p)
        bytes_acc = (int(x_in.size) * x_in.dtype.itemsize
                     + (in_p * mid_p + mid_p * out_p) * 2 + (mid_p + out_p) * 4
                     + n_p * out_p * 4)
        cost = pl.CostEstimate(flops=flops, transcendentals=0,
                               bytes_accessed=bytes_acc)

        def call(single_buffer_weights):
            if single_buffer_weights:
                def resident(shape):
                    return pl.BlockSpec(shape, lambda i: (0, 0),
                                        pipeline_mode=pl.Buffered(1))
            else:
                def resident(shape):
                    return pl.BlockSpec(shape, lambda i: (0, 0))
            return pl.pallas_call(
                _fused_kernel,
                out_shape=jax.ShapeDtypeStruct((n_p, out_p), jnp.float32),
                grid_spec=pltpu.PrefetchScalarGridSpec(
                    num_scalar_prefetch=0,
                    grid=(num_tiles,),
                    in_specs=[
                        pl.BlockSpec((tm, in_p), lambda i: (i, 0)),  # x tile
                        resident((in_p, mid_p)),                     # w1^T (bf16)
                        resident((1, mid_p)),                        # b1 (f32)
                        resident((mid_p, out_p)),                    # w2^T (bf16)
                        resident((1, out_p)),                        # b2 (f32)
                    ],
                    out_specs=pl.BlockSpec((tm, out_p), lambda i: (i, 0)),
                ),
                compiler_params=compiler_params,
                cost_estimate=cost,
            )(x_in, prep["w1_t"], prep["b1_row"], prep["w2_t"], prep["b2_row"])

        try:
            out_padded = call(True)
        except Exception:
            # Pallas version without Buffered(1): fall back to default buffering.
            out_padded = call(False)
        return out_padded[:N, :out_ch]

    # --------------- K-tiled fallback: stream mid-dimension slabs ------------
    if mid_tile is None:
        # 512-wide slabs keep the 256-wide MXUs of v6e/v7x fully fed.
        mid_tile = 512 if mid_p >= 512 else mid_p
    mid_tile = max(128, _round_up(min(mid_tile, mid_p), 128))
    mid_pp = _round_up(mid_p, mid_tile)
    k_tiles = mid_pp // mid_tile

    w1_t = _pad2(prep["w1_t"], (in_p, mid_pp))
    b1_row = _pad2(prep["b1_row"], (1, mid_pp))
    w2_t = _pad2(prep["w2_t"], (mid_pp, out_p))
    b2_row = prep["b2_row"]

    tile_weight_bytes = (2 * (in_p * mid_tile + mid_tile * out_p) * 2   # double-buffered
                         + 2 * mid_tile * 4 + out_p * 4)
    per_row = (2 * in_p * 4 + 2 * out_p * 4
               + in_p * 2 + mid_tile * 4 + 2 * out_p * 4)   # + acc scratch
    free = max(vmem_cap - tile_weight_bytes, 4 * 1024 * 1024)
    tm = min(max_tile_m, max(16, (free // per_row) // 16 * 16))
    num_tiles = _cdiv(N, tm)
    if num_tiles == 1 and N >= 64:
        num_tiles = 2
    tm = _round_up(_cdiv(N, num_tiles), 16)
    n_p = num_tiles * tm

    needs_pad = (n_p != N) or (in_p != in_ch)
    if needs_pad:
        x_in = _pad2(x.astype(jnp.float32), (n_p, in_p)).astype(jnp.bfloat16)
    else:
        x_in = x.astype(jnp.float32)

    vmem_est = tile_weight_bytes + tm * per_row
    flops = 2 * n_p * (in_p * mid_pp + mid_pp * out_p)
    bytes_acc = (int(x_in.size) * x_in.dtype.itemsize
                 + (in_p * mid_pp + mid_pp * out_p) * 2 + (mid_pp + out_p) * 4
                 + n_p * out_p * 4)

    out_padded = pl.pallas_call(
        _ktiled_kernel,
        out_shape=jax.ShapeDtypeStruct((n_p, out_p), jnp.float32),
        grid_spec=pltpu.PrefetchScalarGridSpec(
            num_scalar_prefetch=0,
            grid=(num_tiles, k_tiles),                      # reduction axis last
            in_specs=[
                pl.BlockSpec((tm, in_p), lambda i, k: (i, 0)),
                pl.BlockSpec((in_p, mid_tile), lambda i, k: (0, k)),
                pl.BlockSpec((1, mid_tile), lambda i, k: (0, k)),
                pl.BlockSpec((mid_tile, out_p), lambda i, k: (k, 0)),
                pl.BlockSpec((1, out_p), lambda i, k: (0, 0)),
            ],
            out_specs=pl.BlockSpec((tm, out_p), lambda i, k: (i, 0)),
            scratch_shapes=[pltpu.VMEM((tm, out_p), jnp.float32)],
        ),
        compiler_params=pltpu.CompilerParams(
            dimension_semantics=("parallel", "arbitrary"),
            vmem_limit_bytes=min(vmem_cap,
                                 max(int(1.25 * vmem_est), 32 * 1024 * 1024)),
        ),
        cost_estimate=pl.CostEstimate(flops=flops, transcendentals=0,
                                      bytes_accessed=bytes_acc),
    )(x_in, w1_t, b1_row, w2_t, b2_row)
    return out_padded[:N, :out_ch]


# --------------------------------------------------------------------------- #
# Synthetic params + pure-JAX reference (eval-mode PyTorch semantics)
# --------------------------------------------------------------------------- #
def make_params(key, in_ch, out_ch, channel_rate=1):
    mid = int(in_ch * channel_rate)
    k1, k2, k3, k4, k5, k6 = jax.random.split(key, 6)
    return {
        "w1": 0.02 * jax.random.normal(k1, (mid, in_ch), jnp.float32),
        "b1": 0.01 * jax.random.normal(k2, (mid,), jnp.float32),
        "gamma": 1.0 + 0.1 * jax.random.normal(k3, (mid,), jnp.float32),
        "beta": 0.1 * jax.random.normal(k4, (mid,), jnp.float32),
        "running_mean": 0.05 * jax.random.normal(k5, (mid,), jnp.float32),
        "running_var": jnp.ones((mid,), jnp.float32) * 0.9,
        "w2": 0.02 * jax.random.normal(k6, (out_ch, mid), jnp.float32),
        "b2": jnp.zeros((out_ch,), jnp.float32),
    }


def reference(x, p):
    h = x @ p["w1"].T + p["b1"]
    h = (h - p["running_mean"]) / jnp.sqrt(p["running_var"] + BN_EPS) \
        * p["gamma"] + p["beta"]
    h = jnp.maximum(h, 0.0)
    return h @ p["w2"].T + p["b2"]


if __name__ == "__main__":
    key = jax.random.PRNGKey(0)

    # Test 1: aligned shapes (batch=8, in=out=128) -> f32 fast path (no host pad).
    k1, k2, key = jax.random.split(key, 3)
    x1 = jax.random.normal(k1, (8, 128), jnp.float32)
    p1 = make_params(k2, 128, 128)
    prep1 = prepare_params(p1)
    o1 = jax.block_until_ready(channel_compress(x1, prep1))
    r1 = reference(x1, p1)
    assert o1.shape == (8, 128)
    assert jnp.allclose(o1, r1, atol=2e-2, rtol=2e-2), \
        f"max abs err {jnp.max(jnp.abs(o1 - r1))}"

    # Test 2: unaligned batch/features, balanced multi-tile batch grid.
    k1, k2, key = jax.random.split(key, 3)
    x2 = jax.random.normal(k1, (300, 96), jnp.float32)
    p2 = make_params(k2, 96, 72)
    prep2 = prepare_params(p2)
    o2 = jax.block_until_ready(channel_compress(x2, prep2))
    r2 = reference(x2, p2)
    assert o2.shape == (300, 72)
    assert jnp.allclose(o2, r2, atol=2e-2, rtol=2e-2), \
        f"max abs err {jnp.max(jnp.abs(o2 - r2))}"

    # Test 3: K-tiled (mid-dimension) fallback, forced with a small mid tile
    # so the accumulate-over-k path is exercised (mid=256 -> two 128-wide steps).
    k1, k2, key = jax.random.split(key, 3)
    x3 = jax.random.normal(k1, (20, 64), jnp.float32)
    p3 = make_params(k2, 64, 48, channel_rate=4)
    prep3 = prepare_params(p3)
    o3 = jax.block_until_ready(
        channel_compress(x3, prep3, force_mid_tiling=True, mid_tile=128))
    r3 = reference(x3, p3)
    assert o3.shape == (20, 48)
    assert jnp.allclose(o3, r3, atol=2e-2, rtol=2e-2), \
        f"max abs err {jnp.max(jnp.abs(o3 - r3))}"

    print("KERNEL_OK")
</pallas_src>

<mosaic_0001>
module attributes {stable_mosaic.version = 11 : i64} {
  func.func @_fused_kernel(%arg0: i32, %arg1: memref<16x128xbf16, #tpu.memory_space<vmem>>, %arg2: memref<128x128xbf16, #tpu.memory_space<vmem>>, %arg3: memref<1x128xf32, #tpu.memory_space<vmem>>, %arg4: memref<128x128xbf16, #tpu.memory_space<vmem>>, %arg5: memref<1x128xf32, #tpu.memory_space<vmem>>, %arg6: memref<16x128xf32, #tpu.memory_space<vmem>>) attributes {dimension_semantics = [#tpu.dimension_semantics<parallel>], iteration_bounds = array<i64: 1>, scalar_prefetch = 0 : i64, scratch_operands = 0 : i64, tpu.core_type = #tpu.core_type<tc>, window_params = [{transform_indices = @transform_0, window_bounds = array<i64: 16, 128>}, {pipeline_mode = #tpu.pipeline_mode<synchronous>, transform_indices = @transform_1, window_bounds = array<i64: 128, 128>}, {pipeline_mode = #tpu.pipeline_mode<synchronous>, transform_indices = @transform_2, window_bounds = array<i64: 1, 128>}, {pipeline_mode = #tpu.pipeline_mode<synchronous>, transform_indices = @transform_3, window_bounds = array<i64: 128, 128>}, {pipeline_mode = #tpu.pipeline_mode<synchronous>, transform_indices = @transform_4, window_bounds = array<i64: 1, 128>}, {transform_indices = @transform_5, window_bounds = array<i64: 16, 128>}]} {
    %c0 = arith.constant 0 : index
    %c0_0 = arith.constant 0 : index
    %0 = vector.load %arg1[%c0, %c0_0] : memref<16x128xbf16, #tpu.memory_space<vmem>>, vector<16x128xbf16>
    %c0_1 = arith.constant 0 : index
    %c0_2 = arith.constant 0 : index
    %1 = vector.load %arg2[%c0_1, %c0_2] : memref<128x128xbf16, #tpu.memory_space<vmem>>, vector<128x128xbf16>
    %cst = arith.constant dense<0.000000e+00> : vector<16x128xf32>
    %2 = tpu.matmul %0, %1, %cst {dimension_numbers = #tpu.dot_dimension_numbers<[1], [0], [0], [1], [0, 0, 1, 1], [], []>} : vector<16x128xbf16>, vector<128x128xbf16>, vector<16x128xf32> -> vector<16x128xf32>
    %c0_3 = arith.constant 0 : index
    %c0_4 = arith.constant 0 : index
    %3 = vector.load %arg3[%c0_3, %c0_4] : memref<1x128xf32, #tpu.memory_space<vmem>>, vector<1x128xf32>
    %4 = vector.broadcast %3 : vector<1x128xf32> to vector<16x128xf32>
    %5 = arith.addf %2, %4 : vector<16x128xf32>
    %cst_5 = arith.constant 0.000000e+00 : f32
    %6 = vector.broadcast %cst_5 : f32 to vector<16x128xf32>
    %7 = arith.maximumf %5, %6 : vector<16x128xf32>
    %8 = arith.truncf %7 : vector<16x128xf32> to vector<16x128xbf16>
    %c0_6 = arith.constant 0 : index
    %c0_7 = arith.constant 0 : index
    %9 = vector.load %arg4[%c0_6, %c0_7] : memref<128x128xbf16, #tpu.memory_space<vmem>>, vector<128x128xbf16>
    %cst_8 = arith.constant dense<0.000000e+00> : vector<16x128xf32>
    %10 = tpu.matmul %8, %9, %cst_8 {dimension_numbers = #tpu.dot_dimension_numbers<[1], [0], [0], [1], [0, 0, 1, 1], [], []>} : vector<16x128xbf16>, vector<128x128xbf16>, vector<16x128xf32> -> vector<16x128xf32>
    %c0_9 = arith.constant 0 : index
    %c0_10 = arith.constant 0 : index
    %11 = vector.load %arg5[%c0_9, %c0_10] : memref<1x128xf32, #tpu.memory_space<vmem>>, vector<1x128xf32>
    %12 = vector.broadcast %11 : vector<1x128xf32> to vector<16x128xf32>
    %13 = arith.addf %10, %12 : vector<16x128xf32>
    %c0_11 = arith.constant 0 : index
    %c0_12 = arith.constant 0 : index
    %14 = vector.load %arg6[%c0_11, %c0_12] : memref<16x128xf32, #tpu.memory_space<vmem>>, vector<16x128xf32>
    tpu.vector_store %arg6[%c0_11, %c0_12], %13 {strides = array<i32>} : memref<16x128xf32, #tpu.memory_space<vmem>>, vector<16x128xf32>,
    return
  }
  func.func @transform_0(%arg0: i32) -> (i32, i32) {
    %c0_i32 = arith.constant 0 : i32
    %c0_i32_0 = arith.constant 0 : i32
    return %arg0, %c0_i32 : i32, i32
  }
  func.func @transform_1(%arg0: i32) -> (i32, i32) {
    %c0_i32 = arith.constant 0 : i32
    %c0_i32_0 = arith.constant 0 : i32
    %c0_i32_1 = arith.constant 0 : i32
    return %c0_i32, %c0_i32_0 : i32, i32
  }
  func.func @transform_2(%arg0: i32) -> (i32, i32) {
    %c0_i32 = arith.constant 0 : i32
    %c0_i32_0 = arith.constant 0 : i32
    %c0_i32_1 = arith.constant 0 : i32
    return %c0_i32, %c0_i32_0 : i32, i32
  }
  func.func @transform_3(%arg0: i32) -> (i32, i32) {
    %c0_i32 = arith.constant 0 : i32
    %c0_i32_0 = arith.constant 0 : i32
    %c0_i32_1 = arith.constant 0 : i32
    return %c0_i32, %c0_i32_0 : i32, i32
  }
  func.func @transform_4(%arg0: i32) -> (i32, i32) {
    %c0_i32 = arith.constant 0 : i32
    %c0_i32_0 = arith.constant 0 : i32
    %c0_i32_1 = arith.constant 0 : i32
    return %c0_i32, %c0_i32_0 : i32, i32
  }
  func.func @transform_5(%arg0: i32) -> (i32, i32) {
    %c0_i32 = arith.constant 0 : i32
    %c0_i32_0 = arith.constant 0 : i32
    return %arg0, %c0_i32 : i32, i32
  }
}

module attributes {stable_mosaic.version = 11 : i64} {
  func.func @_fused_kernel(%arg0: i32, %arg1: memref<16x128xbf16, #tpu.memory_space<vmem>>, %arg2: memref<128x128xbf16, #tpu.memory_space<vmem>>, %arg3: memref<1x128xf32, #tpu.memory_space<vmem>>, %arg4: memref<128x128xbf16, #tpu.memory_space<vmem>>, %arg5: memref<1x128xf32, #tpu.memory_space<vmem>>, %arg6: memref<16x128xf32, #tpu.memory_space<vmem>>) attributes {dimension_semantics = [#tpu.dimension_semantics<parallel>], iteration_bounds = array<i64: 1>, scalar_prefetch = 0 : i64, scratch_operands = 0 : i64, tpu.core_type = #tpu.core_type<tc>, window_params = [{transform_indices = @transform_0, window_bounds = array<i64: 16, 128>}, {pipeline_mode = #tpu.pipeline_mode<synchronous>, transform_indices = @transform_1, window_bounds = array<i64: 128, 128>}, {pipeline_mode = #tpu.pipeline_mode<synchronous>, transform_indices = @transform_2, window_bounds = array<i64: 1, 128>}, {pipeline_mode = #tpu.pipeline_mode<synchronous>, transform_indices = @transform_3, window_bounds = array<i64: 128, 128>}, {pipeline_mode = #tpu.pipeline_mode<synchronous>, transform_indices = @transform_4, window_bounds = array<i64: 1, 128>}, {transform_indices = @transform_5, window_bounds = array<i64: 16, 128>}]} {
    %c0 = arith.constant 0 : index
    %c0_0 = arith.constant 0 : index
    %0 = vector.load %arg1[%c0, %c0_0] : memref<16x128xbf16, #tpu.memory_space<vmem>>, vector<16x128xbf16>
    %c0_1 = arith.constant 0 : index
    %c0_2 = arith.constant 0 : index
    %1 = vector.load %arg2[%c0_1, %c0_2] : memref<128x128xbf16, #tpu.memory_space<vmem>>, vector<128x128xbf16>
    %cst = arith.constant dense<0.000000e+00> : vector<16x128xf32>
    %2 = tpu.matmul %0, %1, %cst {dimension_numbers = #tpu.dot_dimension_numbers<[1], [0], [0], [1], [0, 0, 1, 1], [], []>} : vector<16x128xbf16>, vector<128x128xbf16>, vector<16x128xf32> -> vector<16x128xf32>
    %c0_3 = arith.constant 0 : index
    %c0_4 = arith.constant 0 : index
    %3 = vector.load %arg3[%c0_3, %c0_4] : memref<1x128xf32, #tpu.memory_space<vmem>>, vector<1x128xf32>
    %4 = vector.broadcast %3 : vector<1x128xf32> to vector<16x128xf32>
    %5 = arith.addf %2, %4 : vector<16x128xf32>
    %cst_5 = arith.constant 0.000000e+00 : f32
    %6 = vector.broadcast %cst_5 : f32 to vector<16x128xf32>
    %7 = arith.maximumf %5, %6 : vector<16x128xf32>
    %8 = arith.truncf %7 : vector<16x128xf32> to vector<16x128xbf16>
    %c0_6 = arith.constant 0 : index
    %c0_7 = arith.constant 0 : index
    %9 = vector.load %arg4[%c0_6, %c0_7] : memref<128x128xbf16, #tpu.memory_space<vmem>>, vector<128x128xbf16>
    %cst_8 = arith.constant dense<0.000000e+00> : vector<16x128xf32>
    %10 = tpu.matmul %8, %9, %cst_8 {dimension_numbers = #tpu.dot_dimension_numbers<[1], [0], [0], [1], [0, 0, 1, 1], [], []>} : vector<16x128xbf16>, vector<128x128xbf16>, vector<16x128xf32> -> vector<16x128xf32>
    %c0_9 = arith.constant 0 : index
    %c0_10 = arith.constant 0 : index
    %11 = vector.load %arg5[%c0_9, %c0_10] : memref<1x128xf32, #tpu.memory_space<vmem>>, vector<1x128xf32>
    %12 = vector.broadcast %11 : vector<1x128xf32> to vector<16x128xf32>
    %13 = arith.addf %10, %12 : vector<16x128xf32>
    %c0_11 = arith.constant 0 : index
    %c0_12 = arith.constant 0 : index
    %14 = vector.load %arg6[%c0_11, %c0_12] : memref<16x128xf32, #tpu.memory_space<vmem>>, vector<16x128xf32>
    tpu.vector_store %arg6[%c0_11, %c0_12], %13 {strides = array<i32>} : memref<16x128xf32, #tpu.memory_space<vmem>>, vector<16x128xf32>,
    return
  }
  func.func @transform_0(%arg0: i32) -> (i32, i32) {
    %c0_i32 = arith.constant 0 : i32
    %c0_i32_0 = arith.constant 0 : i32
    return %arg0, %c0_i32 : i32, i32
  }
  func.func @transform_1(%arg0: i32) -> (i32, i32) {
    %c0_i32 = arith.constant 0 : i32
    %c0_i32_0 = arith.constant 0 : i32
    %c0_i32_1 = arith.constant 0 : i32
    return %c0_i32, %c0_i32_0 : i32, i32
  }
  func.func @transform_2(%arg0: i32) -> (i32, i32) {
    %c0_i32 = arith.constant 0 : i32
    %c0_i32_0 = arith.constant 0 : i32
    %c0_i32_1 = arith.constant 0 : i32
    return %c0_i32, %c0_i32_0 : i32, i32
  }
  func.func @transform_3(%arg0: i32) -> (i32, i32) {
    %c0_i32 = arith.constant 0 : i32
    %c0_i32_0 = arith.constant 0 : i32
    %c0_i32_1 = arith.constant 0 : i32
    return %c0_i32, %c0_i32_0 : i32, i32
  }
  func.func @transform_4(%arg0: i32) -> (i32, i32) {
    %c0_i32 = arith.constant 0 : i32
    %c0_i32_0 = arith.constant 0 : i32
    %c0_i32_1 = arith.constant 0 : i32
    return %c0_i32, %c0_i32_0 : i32, i32
  }
  func.func @transform_5(%arg0: i32) -> (i32, i32) {
    %c0_i32 = arith.constant 0 : i32
    %c0_i32_0 = arith.constant 0 : i32
    return %arg0, %c0_i32 : i32, i32
  }
}

</mosaic_0001>

<bundles_post_ra>
// kernel: tpu_custom_call.1
= control target key start
LH: loop header
LB: loop body
LE: loop exit
PB: predicated region body
PF: predicated region fallthrough
CT: control target
= control target key end

     0   :  { %10 = vsyncpa [#allocation3], 0  ;;  %s518_s0 = inlined_call_operand.hbm [shape: bf16[16,128], index: 0, kind: input, shape index: {}]   ;;  %s519_s1 = inlined_call_operand.hbm [shape: bf16[128,128], index: 1, kind: input, shape index: {}]   ;;  %s520_s2 = inlined_call_operand.vmem [shape: f32[1,128], index: 2, kind: input, shape index: {}]   ;;  %s521_s3 = inlined_call_operand.hbm [shape: bf16[128,128], index: 3, kind: input, shape index: {}]   ;;  %s522_s4 = inlined_call_operand.vmem [shape: f32[1,128], index: 4, kind: input, shape index: {}]   ;;  %s523_s5 = inlined_call_operand.hbm [shape: f32[16,128], index: 5, kind: output, shape index: {}]  }
   0x1   :  { %11 = vsyncpa [#allocation6], 0 }
   0x2   :  { %12 = vsyncpa [#allocation4], 0  ;;  %s30_s20 = sshll.u32 %s519_s1, 4  ;;  %s462_s21 = smov [#allocation5]   ;;  %s31_s20 = int_to_ptr.hbm [resolvable:$true] %s30_s20 }
   0x3   :  { %s32_s22 = sshll.u32 %s462_s21, 4  ;;  %s17_s25 = sshll.u32 %s518_s0, 4  ;;  %s33_s22 = int_to_ptr.vmem [resolvable:$true] %s32_s22  ;;  %s18_s25 = int_to_ptr.hbm [resolvable:$true] %s17_s25 }
   0x4   :  { %s463_s26 = smov 64   ;;  %s464_s27 = smov 4  }
   0x5   :  { %38 = dma.hbm_to_vmem [thread:$0]  %s31_s20, 1024, %s33_s22, [#allocation6], %s463_s26, %s463_s26, %s464_s27  }
   0x6   :  { %s465_s28 = smov [#allocation2]   ;;  %s45_s7 = sshll.u32 %s521_s3, 4  ;;  %s46_s7 = int_to_ptr.hbm [resolvable:$true] %s45_s7 }
   0x7   :  { %s19_s29 = sshll.u32 %s465_s28, 4  ;;  %s466_s1 = smov [#allocation7]   ;;  %s20_s29 = int_to_ptr.vmem [resolvable:$true] %s19_s29 }
   0x8   :  { %25 = dma.hbm_to_vmem [thread:$0]  %s18_s25, 128, %s20_s29, [#allocation3], %s463_s26, %s463_s26, %s464_s27  }
   0x9   :  { %s47_s8 = sshll.u32 %s466_s1, 4  ;;  %s48_s8 = int_to_ptr.vmem [resolvable:$true] %s47_s8 }
   0xa   :  { %53 = dma.hbm_to_vmem [thread:$0]  %s46_s7, 1024, %s48_s8, [#allocation6], %s463_s26, %s463_s26, %s464_s27  }
   0xb   :  { %456 = dma.done.wait [#allocation3], 128  }
   0xc   :  { %457 = vsyncadd [#allocation3], 4294967168 }
   0xd   :  { %458 = dma.done.wait [#allocation6], 2048  }
   0xe   :  { %459 = vsyncadd [#allocation6], 4294965248  ;;  %v341_v0 = vld [vmem:[#allocation5 + $0x38] sm:$0xff]  ;;  %v340_v1 = vld [vmem:[#allocation5 + $0x30] sm:$0xff]  ;;  %s467_s11 = smov [#allocation8]   ;;  %s468_s15 = smov 128  }
   0xf   :  { %144 = vmatpush.bf16.msra.mxu0 %v341_v0  ;;  %v349_v2 = vld [vmem:[#allocation7 + $0x38] sm:$0xff]  ;;  %v348_v3 = vld [vmem:[#allocation7 + $0x30] sm:$0xff]  ;;  %v339_v4 = vld [vmem:[#allocation5 + $0x28] sm:$0xff]  ;;  %s249_s12 = sshll.u32 %s467_s11, 4  ;;  %s469_s16 = smov 8   ;;  %s250_s12 = int_to_ptr.vmem [resolvable:$true] %s249_s12 }
  0x10   :  { %229 = vmatpush.bf16.msra.mxu1 %v349_v2  ;;  %v347_v5 = vld [vmem:[#allocation7 + $0x28] sm:$0xff]  ;;  %v338_v6 = vld [vmem:[#allocation5 + $0x20] sm:$0xff]  ;;  %v337_v8 = vld [vmem:[#allocation5 + $0x18] sm:$0xff] }
  0x11   :  { %v346_v7 = vld [vmem:[#allocation7 + $0x20] sm:$0xff]  ;;  %v336_v9 = vld [vmem:[#allocation5 + $0x10] sm:$0xff]  ;;  %v335_v10 = vld [vmem:[#allocation5 + $0x8] sm:$0xff] }
  0x12   :  { %v334_v11 = vld [vmem:[#allocation5] sm:$0xff]  ;;  %v333_v12 = vld [vmem:[#allocation2] sm:$0xff]  ;;  %v344_v14 = vld [vmem:[#allocation7 + $0x10] sm:$0xff] }
  0x13   :  { %145 = vmatpush.bf16.msra.mxu0 %v340_v1  ;;  %v345_v13 = vld [vmem:[#allocation7 + $0x18] sm:$0xff]  ;;  %v343_v15 = vld [vmem:[#allocation7 + $0x8] sm:$0xff]  ;;  %v342_v16 = vld [vmem:[#allocation7] sm:$0xff] }
  0x14   :  { %230 = vmatpush.bf16.msra.mxu1 %v348_v3  ;;  %v358_v18 = vld [vmem:[%s520_s2] ss:$0 sm:$0xff]  ;;  %s251_s2 = sshll.u32 %s523_s5, 4  ;;  %s252_s2 = int_to_ptr.hbm [resolvable:$true] %s251_s2 }
  0x15   :  { %v359_v25 = vld [vmem:[%s522_s4] ss:$0 sm:$0xff] }
  0x17   :  { %146 = vmatpush.bf16.msra.mxu0 %v339_v4 }
  0x18   :  { %231 = vmatpush.bf16.msra.mxu1 %v347_v5 }
  0x1b   :  { %147 = vmatpush.bf16.msra.mxu0 %v338_v6 }
  0x1c   :  { %232 = vmatpush.bf16.msra.mxu1 %v346_v7 }
  0x1f   :  { %148 = vmatpush.bf16.msra.mxu0 %v337_v8 }
  0x20   :  { %233 = vmatpush.bf16.msra.mxu1 %v345_v13 }
  0x23   :  { %149 = vmatpush.bf16.msra.mxu0 %v336_v9 }
  0x24   :  { %234 = vmatpush.bf16.msra.mxu1 %v344_v14 }
  0x27   :  { %150 = vmatpush.bf16.msra.mxu0 %v335_v10 }
  0x28   :  { %235 = vmatpush.bf16.msra.mxu1 %v343_v15 }
  0x2b   :  { %151 = vmatpush.bf16.msra.mxu0 %v334_v11 }
  0x2c   :  { %236 = vmatpush.bf16.msra.mxu1 %v342_v16 }
  0x2e   :  { %152 = vmatmul.bf16.vlgmr.msra.gmra.mxu0 %v333_v12 }
  0xab   :  { %v153_v17 = vpop.f32.mrf.mxu0 }
  0xac   :  { %v154_v19 = vadd.f32 %v358_v18, %v153_v17 }
  0xae   :  { %v158_v22 = vmax.f32 %v154_v19, 0.0 }
  0xb3   :  { %v155_v20 = vpop.f32.mrf.mxu0 }
  0xb4   :  { %v156_v21 = vadd.f32 %v358_v18, %v155_v20 }
  0xb6   :  { %v159_v23 = vmax.f32 %v156_v21, 0.0 }
  0xb8   :  { %v160_v24 = vpack.c.bf16 %v159_v23, %v158_v22 }
  0xba   :  { %237 = vmatmul.bf16.vlgmr.msra.gmra.mxu1 %v160_v24 }
 0x137   :  { %v238_v26 = vpop.f32.mrf.mxu1 }
 0x138   :  { %v239_v27 = vadd.f32 %v359_v25, %v238_v26 }
 0x13a   :  { %243 = vst [vmem:[#allocation8] sm:$0xff] %v239_v27 }
 0x13f   :  { %v240_v28 = vpop.f32.mrf.mxu1 }
 0x140   :  { %v241_v29 = vadd.f32 %v359_v25, %v240_v28 }
 0x142   :  { %244 = vst [vmem:[#allocation8 + $0x8] sm:$0xff] %v241_v29 }
 0x143   :  { %257 = dma.vmem_to_hbm [thread:$0]  %s250_s12, 256, %s252_s2, [#allocation4], %s468_s15, %s468_s15, %s469_s16  }
 0x144   :  { %460 = dma.done.wait [#allocation4], 256  }
 0x145   :  { %461 = vsyncadd [#allocation4], 4294967040 }
 0x146   :  { %262 = vsyncpa [#allocation3], 1 }
 0x147   :  { %263 = vsyncpa [#allocation6], 1 }
 0x148   :  { %264 = vsyncpa [#allocation4], 1 }

// kernel: tpu_custom_call.1
= control target key start
LH: loop header
LB: loop body
LE: loop exit
PB: predicated region body
PF: predicated region fallthrough
CT: control target
= control target key end

     0   :  { %10 = vsyncpa [#allocation3], 0  ;;  %s518_s0 = inlined_call_operand.hbm [shape: bf16[16,128], index: 0, kind: input, shape index: {}]   ;;  %s519_s1 = inlined_call_operand.hbm [shape: bf16[128,128], index: 1, kind: input, shape index: {}]   ;;  %s520_s2 = inlined_call_operand.vmem [shape: f32[1,128], index: 2, kind: input, shape index: {}]   ;;  %s521_s3 = inlined_call_operand.hbm [shape: bf16[128,128], index: 3, kind: input, shape index: {}]   ;;  %s522_s4 = inlined_call_operand.vmem [shape: f32[1,128], index: 4, kind: input, shape index: {}]   ;;  %s523_s5 = inlined_call_operand.hbm [shape: f32[16,128], index: 5, kind: output, shape index: {}]  }
   0x1   :  { %11 = vsyncpa [#allocation6], 0 }
   0x2   :  { %12 = vsyncpa [#allocation4], 0  ;;  %s30_s20 = sshll.u32 %s519_s1, 4  ;;  %s462_s21 = smov [#allocation5]   ;;  %s31_s20 = int_to_ptr.hbm [resolvable:$true] %s30_s20 }
   0x3   :  { %s32_s22 = sshll.u32 %s462_s21, 4  ;;  %s17_s25 = sshll.u32 %s518_s0, 4  ;;  %s33_s22 = int_to_ptr.vmem [resolvable:$true] %s32_s22  ;;  %s18_s25 = int_to_ptr.hbm [resolvable:$true] %s17_s25 }
   0x4   :  { %s463_s26 = smov 64   ;;  %s464_s27 = smov 4  }
   0x5   :  { %38 = dma.hbm_to_vmem [thread:$0]  %s31_s20, 1024, %s33_s22, [#allocation6], %s463_s26, %s463_s26, %s464_s27  }
   0x6   :  { %s465_s28 = smov [#allocation2]   ;;  %s45_s7 = sshll.u32 %s521_s3, 4  ;;  %s46_s7 = int_to_ptr.hbm [resolvable:$true] %s45_s7 }
   0x7   :  { %s19_s29 = sshll.u32 %s465_s28, 4  ;;  %s466_s1 = smov [#allocation7]   ;;  %s20_s29 = int_to_ptr.vmem [resolvable:$true] %s19_s29 }
   0x8   :  { %25 = dma.hbm_to_vmem [thread:$0]  %s18_s25, 128, %s20_s29, [#allocation3], %s463_s26, %s463_s26, %s464_s27  }
   0x9   :  { %s47_s8 = sshll.u32 %s466_s1, 4  ;;  %s48_s8 = int_to_ptr.vmem [resolvable:$true] %s47_s8 }
   0xa   :  { %53 = dma.hbm_to_vmem [thread:$0]  %s46_s7, 1024, %s48_s8, [#allocation6], %s463_s26, %s463_s26, %s464_s27  }
   0xb   :  { %456 = dma.done.wait [#allocation3], 128  }
   0xc   :  { %457 = vsyncadd [#allocation3], 4294967168 }
   0xd   :  { %458 = dma.done.wait [#allocation6], 2048  }
   0xe   :  { %459 = vsyncadd [#allocation6], 4294965248  ;;  %v341_v0 = vld [vmem:[#allocation5 + $0x38] sm:$0xff]  ;;  %v340_v1 = vld [vmem:[#allocation5 + $0x30] sm:$0xff]  ;;  %s467_s11 = smov [#allocation8]   ;;  %s468_s15 = smov 128  }
   0xf   :  { %144 = vmatpush.bf16.msra.mxu0 %v341_v0  ;;  %v349_v2 = vld [vmem:[#allocation7 + $0x38] sm:$0xff]  ;;  %v348_v3 = vld [vmem:[#allocation7 + $0x30] sm:$0xff]  ;;  %v339_v4 = vld [vmem:[#allocation5 + $0x28] sm:$0xff]  ;;  %s249_s12 = sshll.u32 %s467_s11, 4  ;;  %s469_s16 = smov 8   ;;  %s250_s12 = int_to_ptr.vmem [resolvable:$true] %s249_s12 }
  0x10   :  { %229 = vmatpush.bf16.msra.mxu1 %v349_v2  ;;  %v347_v5 = vld [vmem:[#allocation7 + $0x28] sm:$0xff]  ;;  %v338_v6 = vld [vmem:[#allocation5 + $0x20] sm:$0xff]  ;;  %v337_v8 = vld [vmem:[#allocation5 + $0x18] sm:$0xff] }
  0x11   :  { %v346_v7 = vld [vmem:[#allocation7 + $0x20] sm:$0xff]  ;;  %v336_v9 = vld [vmem:[#allocation5 + $0x10] sm:$0xff]  ;;  %v335_v10 = vld [vmem:[#allocation5 + $0x8] sm:$0xff] }
  0x12   :  { %v334_v11 = vld [vmem:[#allocation5] sm:$0xff]  ;;  %v333_v12 = vld [vmem:[#allocation2] sm:$0xff]  ;;  %v344_v14 = vld [vmem:[#allocation7 + $0x10] sm:$0xff] }
  0x13   :  { %145 = vmatpush.bf16.msra.mxu0 %v340_v1  ;;  %v345_v13 = vld [vmem:[#allocation7 + $0x18] sm:$0xff]  ;;  %v343_v15 = vld [vmem:[#allocation7 + $0x8] sm:$0xff]  ;;  %v342_v16 = vld [vmem:[#allocation7] sm:$0xff] }
  0x14   :  { %230 = vmatpush.bf16.msra.mxu1 %v348_v3  ;;  %v358_v18 = vld [vmem:[%s520_s2] ss:$0 sm:$0xff]  ;;  %s251_s2 = sshll.u32 %s523_s5, 4  ;;  %s252_s2 = int_to_ptr.hbm [resolvable:$true] %s251_s2 }
  0x15   :  { %v359_v25 = vld [vmem:[%s522_s4] ss:$0 sm:$0xff] }
  0x17   :  { %146 = vmatpush.bf16.msra.mxu0 %v339_v4 }
  0x18   :  { %231 = vmatpush.bf16.msra.mxu1 %v347_v5 }
  0x1b   :  { %147 = vmatpush.bf16.msra.mxu0 %v338_v6 }
  0x1c   :  { %232 = vmatpush.bf16.msra.mxu1 %v346_v7 }
  0x1f   :  { %148 = vmatpush.bf16.msra.mxu0 %v337_v8 }
  0x20   :  { %233 = vmatpush.bf16.msra.mxu1 %v345_v13 }
  0x23   :  { %149 = vmatpush.bf16.msra.mxu0 %v336_v9 }
  0x24   :  { %234 = vmatpush.bf16.msra.mxu1 %v344_v14 }
  0x27   :  { %150 = vmatpush.bf16.msra.mxu0 %v335_v10 }
  0x28   :  { %235 = vmatpush.bf16.msra.mxu1 %v343_v15 }
  0x2b   :  { %151 = vmatpush.bf16.msra.mxu0 %v334_v11 }
  0x2c   :  { %236 = vmatpush.bf16.msra.mxu1 %v342_v16 }
  0x2e   :  { %152 = vmatmul.bf16.vlgmr.msra.gmra.mxu0 %v333_v12 }
  0xab   :  { %v153_v17 = vpop.f32.mrf.mxu0 }
  0xac   :  { %v154_v19 = vadd.f32 %v358_v18, %v153_v17 }
  0xae   :  { %v158_v22 = vmax.f32 %v154_v19, 0.0 }
  0xb3   :  { %v155_v20 = vpop.f32.mrf.mxu0 }
  0xb4   :  { %v156_v21 = vadd.f32 %v358_v18, %v155_v20 }
  0xb6   :  { %v159_v23 = vmax.f32 %v156_v21, 0.0 }
  0xb8   :  { %v160_v24 = vpack.c.bf16 %v159_v23, %v158_v22 }
  0xba   :  { %237 = vmatmul.bf16.vlgmr.msra.gmra.mxu1 %v160_v24 }
 0x137   :  { %v238_v26 = vpop.f32.mrf.mxu1 }
 0x138   :  { %v239_v27 = vadd.f32 %v359_v25, %v238_v26 }
 0x13a   :  { %243 = vst [vmem:[#allocation8] sm:$0xff] %v239_v27 }
 0x13f   :  { %v240_v28 = vpop.f32.mrf.mxu1 }
 0x140   :  { %v241_v29 = vadd.f32 %v359_v25, %v240_v28 }
 0x142   :  { %244 = vst [vmem:[#allocation8 + $0x8] sm:$0xff] %v241_v29 }
 0x143   :  { %257 = dma.vmem_to_hbm [thread:$0]  %s250_s12, 256, %s252_s2, [#allocation4], %s468_s15, %s468_s15, %s469_s16  }
 0x144   :  { %460 = dma.done.wait [#allocation4], 256  }
 0x145   :  { %461 = vsyncadd [#allocation4], 4294967040 }
 0x146   :  { %262 = vsyncpa [#allocation3], 1 }
 0x147   :  { %263 = vsyncpa [#allocation6], 1 }
 0x148   :  { %264 = vsyncpa [#allocation4], 1 }

</bundles_post_ra>
